<compile_context>
chip_gen: v7x
topology: tpu7x:2x2x1
jax: 0.10.0
libtpu: 0.0.40
codegen_flags: <defaults>
</compile_context>

<pallas_src>
import functools

import jax
import jax.numpy as jnp
from jax.experimental import pallas as pl
from jax.experimental.pallas import tpu as pltpu


def _linear_kernel(x_ref, wt_ref, b_ref, o_ref, acc_ref):
    """One (tm, tn) output tile; K axis (grid dim 2) is the reduction."""
    k = pl.program_id(2)

    @pl.when(k == 0)
    def _():
        acc_ref[...] = jnp.zeros_like(acc_ref)

    # wt is already (K, N): straight MXU feed, no transpose inside the kernel.
    acc_ref[...] += jnp.dot(
        x_ref[...], wt_ref[...], preferred_element_type=jnp.float32
    )

    @pl.when(k == pl.num_programs(2) - 1)
    def _():
        # Bias folded into the single finalize pass; (1, tn) broadcasts over tm.
        o_ref[...] = (acc_ref[...] + b_ref[...]).astype(o_ref.dtype)


@functools.partial(jax.jit, static_argnames=("tm", "tn", "tk", "compute_dtype"))
def module_forward(x, w, b, *, tm=128, tn=128, tk=256, compute_dtype=None):
    """Module.forward(X) with net = nn.Linear(D_in, D_out).

    x: (N, D_in) float32
    w: (D_out, D_in)  (PyTorch Linear weight layout)
    b: (D_out,)
    compute_dtype: optionally jnp.bfloat16 on v6e/v7x to double MXU throughput
                   (accumulation stays f32 via preferred_element_type).
    """
    n, d_in = x.shape
    d_out, d_in_w = w.shape
    assert d_in == d_in_w

    # Pre-transpose W outside the kernel: (D_in, D_out).
    wt = w.T
    if compute_dtype is not None:
        x = x.astype(compute_dtype)
        wt = wt.astype(compute_dtype)

    # Pad to tile multiples -> lane-dense (>=128) blocks everywhere.
    # Zero padding is exact for matmul + bias; extra rows/cols sliced off below.
    mp = pl.cdiv(n, tm) * tm
    np_ = pl.cdiv(d_out, tn) * tn
    kp = pl.cdiv(d_in, tk) * tk

    if (mp, kp) != (n, d_in):
        x = jnp.pad(x, ((0, mp - n), (0, kp - d_in)))
    if (kp, np_) != (d_in, d_out):
        wt = jnp.pad(wt, ((0, kp - d_in), (0, np_ - d_out)))
    if np_ != d_out:
        b = jnp.pad(b, (0, np_ - d_out))
    b2 = b.astype(jnp.float32).reshape(1, np_)

    grid = (mp // tm, np_ // tn, kp // tk)

    elem_bytes = jnp.dtype(x.dtype).itemsize
    cost = pl.CostEstimate(
        flops=2 * mp * np_ * kp,
        transcendentals=0,
        bytes_accessed=(mp * kp + kp * np_ + np_) * elem_bytes + mp * np_ * 4,
    )

    out_p = pl.pallas_call(
        _linear_kernel,
        out_shape=jax.ShapeDtypeStruct((mp, np_), jnp.float32),
        grid_spec=pltpu.PrefetchScalarGridSpec(
            num_scalar_prefetch=0,
            grid=grid,
            in_specs=[
                pl.BlockSpec((tm, tk), lambda i, j, k: (i, k)),   # X tile
                pl.BlockSpec((tk, tn), lambda i, j, k: (k, j)),   # W^T tile
                pl.BlockSpec((1, tn), lambda i, j, k: (0, j)),    # bias tile
            ],
            out_specs=pl.BlockSpec((tm, tn), lambda i, j, k: (i, j)),
            scratch_shapes=[pltpu.VMEM((tm, tn), jnp.float32)],
        ),
        compiler_params=pltpu.CompilerParams(
            dimension_semantics=("parallel", "parallel", "arbitrary"),
            vmem_limit_bytes=32 * 1024 * 1024,  # safe on v7x's 64 MiB / TC
        ),
        cost_estimate=cost,
    )(x, wt, b2)

    # Slice padding back off.
    return out_p[:n, :d_out]


if __name__ == "__main__":
    key = jax.random.PRNGKey(0)
    kx, kw, kb = jax.random.split(key, 3)

    # Modest but MXU/tile-friendly shapes: batch=256, D_in=512, D_out=256
    # -> grid (2, 2, 2), exercises the pipelined reduction + parallel axes.
    N, D_IN, D_OUT = 256, 512, 256

    x = jax.random.normal(kx, (N, D_IN), dtype=jnp.float32)
    bound = 1.0 / (D_IN ** 0.5)
    w = jax.random.uniform(kw, (D_OUT, D_IN), minval=-bound, maxval=bound,
                           dtype=jnp.float32)
    b = jax.random.uniform(kb, (D_OUT,), minval=-bound, maxval=bound,
                           dtype=jnp.float32)

    out = module_forward(x, w, b)
    jax.block_until_ready(out)
    ref = x @ w.T + b
    assert out.shape == (N, D_OUT)
    assert jnp.allclose(out, ref, atol=1e-4, rtol=1e-4)

    # Also cover the literal d2l toy shape (8, 32) -> 32 via the padding path.
    # TODO(synk): at this size plain XLA dot beats any pallas_call; kept for parity.
    xt = jax.random.normal(kx, (8, 32), dtype=jnp.float32)
    wt_ = jax.random.uniform(kw, (32, 32), minval=-bound, maxval=bound,
                             dtype=jnp.float32)
    bt = jax.random.uniform(kb, (32,), minval=-bound, maxval=bound,
                            dtype=jnp.float32)
    out_t = module_forward(xt, wt_, bt)
    jax.block_until_ready(out_t)
    ref_t = xt @ wt_.T + bt
    assert out_t.shape == (8, 32)
    assert jnp.allclose(out_t, ref_t, atol=1e-4, rtol=1e-4)

    print("KERNEL_OK")
</pallas_src>

<mosaic_0001>
module attributes {stable_mosaic.version = 11 : i64} {
  func.func @_linear_kernel(%arg0: i32, %arg1: i32, %arg2: i32, %arg3: memref<128x256xf32, #tpu.memory_space<vmem>>, %arg4: memref<256x128xf32, #tpu.memory_space<vmem>>, %arg5: memref<1x128xf32, #tpu.memory_space<vmem>>, %arg6: memref<128x128xf32, #tpu.memory_space<vmem>>, %arg7: memref<128x128xf32, #tpu.memory_space<vmem>>) attributes {dimension_semantics = [#tpu.dimension_semantics<parallel>, #tpu.dimension_semantics<parallel>, #tpu.dimension_semantics<arbitrary>], iteration_bounds = array<i64: 2, 2, 2>, scalar_prefetch = 0 : i64, scratch_operands = 1 : i64, tpu.core_type = #tpu.core_type<tc>, window_params = [{transform_indices = @transform_0, window_bounds = array<i64: 128, 256>}, {transform_indices = @transform_1, window_bounds = array<i64: 256, 128>}, {transform_indices = @transform_2, window_bounds = array<i64: 1, 128>}, {transform_indices = @transform_3, window_bounds = array<i64: 128, 128>}]} {
    %c0_i32 = arith.constant 0 : i32
    %0 = arith.cmpi eq, %arg2, %c0_i32 : i32
    %1 = arith.extui %0 : i1 to i32
    %c0_i32_0 = arith.constant 0 : i32
    %2 = arith.cmpi ne, %1, %c0_i32_0 : i32
    scf.if %2 {
      %cst_9 = arith.constant 0.000000e+00 : f32
      %12 = vector.broadcast %cst_9 : f32 to vector<128x128xf32>
      %c0_10 = arith.constant 0 : index
      %c0_11 = arith.constant 0 : index
      %13 = vector.load %arg7[%c0_10, %c0_11] : memref<128x128xf32, #tpu.memory_space<vmem>>, vector<128x128xf32>
      tpu.vector_store %arg7[%c0_10, %c0_11], %12 {strides = array<i32>} : memref<128x128xf32, #tpu.memory_space<vmem>>, vector<128x128xf32>,
    } else {
    }
    %c0 = arith.constant 0 : index
    %c0_1 = arith.constant 0 : index
    %3 = vector.load %arg7[%c0, %c0_1] : memref<128x128xf32, #tpu.memory_space<vmem>>, vector<128x128xf32>
    %c0_2 = arith.constant 0 : index
    %c0_3 = arith.constant 0 : index
    %4 = vector.load %arg3[%c0_2, %c0_3] : memref<128x256xf32, #tpu.memory_space<vmem>>, vector<128x256xf32>
    %c0_4 = arith.constant 0 : index
    %c0_5 = arith.constant 0 : index
    %5 = vector.load %arg4[%c0_4, %c0_5] : memref<256x128xf32, #tpu.memory_space<vmem>>, vector<256x128xf32>
    %cst = arith.constant dense<0.000000e+00> : vector<128x128xf32>
    %6 = tpu.matmul %4, %5, %cst {dimension_numbers = #tpu.dot_dimension_numbers<[1], [0], [0], [1], [0, 0, 1, 1], [], []>} : vector<128x256xf32>, vector<256x128xf32>, vector<128x128xf32> -> vector<128x128xf32>
    %7 = arith.addf %3, %6 : vector<128x128xf32>
    %c0_6 = arith.constant 0 : index
    %c0_7 = arith.constant 0 : index
    %8 = vector.load %arg7[%c0_6, %c0_7] : memref<128x128xf32, #tpu.memory_space<vmem>>, vector<128x128xf32>
    tpu.vector_store %arg7[%c0_6, %c0_7], %7 {strides = array<i32>} : memref<128x128xf32, #tpu.memory_space<vmem>>, vector<128x128xf32>,
    %c1_i32 = arith.constant 1 : i32
    %9 = arith.cmpi eq, %arg2, %c1_i32 : i32
    %10 = arith.extui %9 : i1 to i32
    %c0_i32_8 = arith.constant 0 : i32
    %11 = arith.cmpi ne, %10, %c0_i32_8 : i32
    scf.if %11 {
      %c0_9 = arith.constant 0 : index
      %c0_10 = arith.constant 0 : index
      %12 = vector.load %arg7[%c0_9, %c0_10] : memref<128x128xf32, #tpu.memory_space<vmem>>, vector<128x128xf32>
      %c0_11 = arith.constant 0 : index
      %c0_12 = arith.constant 0 : index
      %13 = vector.load %arg5[%c0_11, %c0_12] : memref<1x128xf32, #tpu.memory_space<vmem>>, vector<1x128xf32>
      %14 = vector.broadcast %13 : vector<1x128xf32> to vector<128x128xf32>
      %15 = arith.addf %12, %14 : vector<128x128xf32>
      %c0_13 = arith.constant 0 : index
      %c0_14 = arith.constant 0 : index
      %16 = vector.load %arg6[%c0_13, %c0_14] : memref<128x128xf32, #tpu.memory_space<vmem>>, vector<128x128xf32>
      tpu.vector_store %arg6[%c0_13, %c0_14], %15 {strides = array<i32>} : memref<128x128xf32, #tpu.memory_space<vmem>>, vector<128x128xf32>,
    } else {
    }
    return
  }
  func.func @transform_0(%arg0: i32, %arg1: i32, %arg2: i32) -> (i32, i32) {
    %c0_i32 = arith.constant 0 : i32
    return %arg0, %arg2 : i32, i32
  }
  func.func @transform_1(%arg0: i32, %arg1: i32, %arg2: i32) -> (i32, i32) {
    %c0_i32 = arith.constant 0 : i32
    return %arg2, %arg1 : i32, i32
  }
  func.func @transform_2(%arg0: i32, %arg1: i32, %arg2: i32) -> (i32, i32) {
    %c0_i32 = arith.constant 0 : i32
    %c0_i32_0 = arith.constant 0 : i32
    return %c0_i32, %arg1 : i32, i32
  }
  func.func @transform_3(%arg0: i32, %arg1: i32, %arg2: i32) -> (i32, i32) {
    %c0_i32 = arith.constant 0 : i32
    return %arg0, %arg1 : i32, i32
  }
}

</mosaic_0001>

<bundles_post_ra>
// kernel: module_forward.1
= control target key start
LH: loop header
LB: loop body
LE: loop exit
PB: predicated region body
PF: predicated region fallthrough
CT: control target
= control target key end

     0   :  { %s1877_s0 = inlined_call_operand.vmem [shape: f32[256,512], index: 0, kind: input, shape index: {}]   ;;  %s1878_s1 = inlined_call_operand.vmem [shape: f32[512,256], index: 1, kind: input, shape index: {}]   ;;  %s1879_s2 = inlined_call_operand.vmem [shape: f32[1,256], index: 2, kind: input, shape index: {}]   ;;  %s1880_s3 = inlined_call_operand.hbm [shape: f32[256,256], index: 3, kind: output, shape index: {}]  }
   0x1   :  { %1885 = sst [smem:[#allocation13_spill]] %s1877_s0 }
   0x2   :  { %1886 = sst [smem:[#allocation14_spill]] %s1878_s1 }
   0x3   :  { %1887 = sst [smem:[#allocation15_spill]] %s1879_s2 }
   0x4   :  { %1888 = sst [smem:[#allocation16_spill]] %s1880_s3 }
   0x5   :  { %8 = vsyncpa [#allocation6], 0 }
   0x6   :  { %10 = vsyncpa [#allocation6 + $0x1], 0  ;;  %s1398_s12 = smov 0   ;;  %s1400_s13 = smov 0  }
   0x7   :  { %s1402_s14 = smov 0   ;;  %s1404_s15 = smov 0  }
   0x8   :  { %s1406_s16 = smov 0   ;;  %s1408_s17 = smov 0  }
   0x9   :  { %s1410_s18 = smov 0   ;;  %s1412_s19 = smov 0  }
   0xa   :  { %s1414_s20 = smov 0   ;;  %s1416_s21 = smov 0  }
   0xb   :  { %s1418_s22 = smov 0   ;;  %s1420_s23 = smov 0  }
   0xc   :  { %s1422_s24 = smov 0   ;;  %s1424_s25 = smov 0  }
   0xd LB: > { %1889 = sst [smem:[#allocation8_spill]] %s1347_s19  ;;  %s28_s28 = sadd.s32 1, %s1359_s22  ;;  %s1371_s25 = sphi %s1424_s25, %s16_s25   ;;  %s1367_s24 = sphi %s1422_s24, %s1924_s24   ;;  %s1363_s23 = sphi %s1420_s23, %s1923_s23   ;;  %s1359_s22 = sphi %s1418_s22, %s1922_s22   ;;  %s1355_s21 = sphi %s1416_s21, %s1921_s21   ;;  %s1351_s20 = sphi %s1414_s20, %s1920_s20   ;;  %s1347_s19 = sphi %s1412_s19, %s1919_s19   ;;  %s1343_s18 = sphi %s1410_s18, %s1918_s18   ;;  %s1339_s17 = sphi %s1408_s17, %s1917_s17   ;;  %s1335_s16 = sphi %s1406_s16, %s1916_s16   ;;  %s1331_s15 = sphi %s1404_s15, %s1915_s15   ;;  %s1327_s14 = sphi %s1402_s14, %s1914_s14   ;;  %s1323_s13 = sphi %s1400_s13, %s1913_s13   ;;  %s1319_s12 = sphi %s1398_s12, %s1912_s12  }
   0xe   : > { %1890 = sst [smem:[#allocation9_spill]] %s1355_s21  ;;  %s31_s29 = sadd.s32 1, %s1363_s23 }
   0xf   : > { %p29_p0 = scmp.ge.s32.totalorder %s28_s28, 2  ;;  %s35_s30 = sadd.s32 1, %s1367_s24 }
  0x10   : > { %s44_s4 = sadd.s32 1, %s1343_s18  ;;  %p51_p1 = scmp.ne.s32.totalorder %s1343_s18, %s1339_s17 }
  0x11   : > { %s1926_s28 = smov (%p29_p0, %s28_s28), 0  ;;  %s1928_s29 = smov (!%p29_p0, %s31_s29), %s1363_s23 }
  0x12   : > { %1891 = sst [smem:[#allocation10_spill]] %s1926_s28  ;;  %s40_s5 = ssub.s32 %s1359_s22, %s1926_s28 }
  0x13   : > { %p52_p2 = scmp.eq.s32.totalorder %s1371_s25, 0  ;;  %p33_p3 = scmp.ge.s32.totalorder %s1928_s29, 2 }
  0x14   : > { %s72_s6 = sadd.s32 1, %s1335_s16  ;;  %p79_p5 = scmp.ne.s32.totalorder %s1335_s16, %s1331_s15 }
  0x15   : > { %p1483_p4 = por %p52_p2, %p51_p1  ;;  %s1930_s29 = smov (%p33_p3, %s1928_s29), 0 }
  0x16   : > { %1893 = sst [smem:[#allocation11_spill]] %s1930_s29  ;;  %s1932_s30 = smov (!%p33_p3, %s35_s30), %s1367_s24 }
  0x17   : > { %s68_s8 = ssub.s32 %s1363_s23, %s1930_s29  ;;  %p1494_p6 = por %p79_p5, %p52_p2 }
  0x18   : > { %p37_p7 = scmp.ge.s32.totalorder %s1932_s30, 2  ;;  %s69_s10 = sor.u32 %s68_s8, %s40_s5 }
  0x19   : > { %p70_p8 = scmp.eq.s32.totalorder %s69_s10, 0  ;;  %s126_s11 = sadd.s32 1, %s1327_s14 }
  0x1a   : > { %s1934_s30 = smov (%p37_p7, %s1932_s30), 0  ;;  %p136_p9 = scmp.ne.s32.totalorder %s1327_s14, %s1323_s13 }
  0x1b   : > { %1895 = sst [smem:[#allocation12_spill]] %s1934_s30  ;;  %s39_s26 = ssub.s32 %s1367_s24, %s1934_s30 }
  0x1c   : > { %s1502_s27 = scalar_select %p70_p8, %s1335_s16, %s72_s6  }
  0x1d   : > { %s41_s28 = sor.u32 %s40_s5, %s39_s26  ;;  %s123_s29 = sor.u32 %s68_s8, %s39_s26 }
  0x1e   : > { %p42_p10 = scmp.eq.s32.totalorder %s41_s28, 0  ;;  %p124_p11 = scmp.eq.s32.totalorder %s123_s29, 0 }
  0x1f   : > { %s1896_s3 = sadd.s32 4294967295, %s1371_s25   ;;  %p142_p13 = scmp.ne.s32.totalorder %s1323_s13, %s1319_s12 }
  0x20   : > { %p137_p12 = scmp.eq.s32.totalorder %s1896_s3, 7  ;;  %s1898_s2 = sadd.s32 4294967294, %s1371_s25  }
  0x21   : > { %s1513_s21 = scalar_select %p42_p10, %s1343_s18, %s44_s4  }
  0x22   : > { %s1516_s19 = scalar_select %p124_p11, %s1327_s14, %s126_s11  }
  0x23   : > { %p1518_p0 = por %p137_p12, %p136_p9  ;;  %p143_p1 = scmp.eq.s32.totalorder %s1898_s2, 7 }
  0x24   : > { %p952_p3 = scmp.ge.s32.totalorder %s1371_s25, 8 }
  0x25   : > { %p1524_p2 = por %p143_p1, %p142_p13 }
  0x26   : > { %159 = sbr.rel (%p952_p3) target bundleno = 97 (0x61), region = 16 }
  0x2d   : > { %162 = sbr.rel (!%p1483_p4) target bundleno = 71 (0x47), region = 20  ;;  %s164_s3 = sand.u32 (%p1483_p4), 1, %s1343_s18  }
  0x2e   : > { %s955_s26 = sshll.u32 (%p1483_p4), %s1359_s22, 1  ;;  %s953_s28 = sshll.u32 (%p1483_p4), %s164_s3, 8 }
  0x2f   : > { %s975_s29 = sshll.u32 (%p1483_p4), %s1367_s24, 6  ;;  %s1900_s0 = sld [smem:[#allocation13_spill]] (%p1483_p4) }
  0x30   : > { %s170_s4 = sadd.s32 (%p1483_p4), %s975_s29, %s955_s26  ;;  %s1542_s7 = scalar_lea.vmem (%p1483_p4), [#allocation3], %s953_s28 }
  0x31   : > { %s957_s5 = sshll.u32 (%p1483_p4), %s170_s4, 3 }
  0x35   : > { %s1537_s11 = scalar_lea.vmem %s1900_s0, %s957_s5 }
  0x36   : > { %v185_v0 = vld [vmem:[%s1537_s11] sm:$0xff]  ;;  %v187_v1 = vld [vmem:[%s1537_s11 + $0x8] sm:$0xff] }
  0x37   : > { %v189_v2 = vld [vmem:[%s1537_s11 + $0x20] sm:$0xff]  ;;  %186 = vst [vmem:[%s1542_s7] sm:$0xff] %v185_v0  ;;  %188 = vst [vmem:[%s1542_s7 + $0x8] sm:$0xff] %v187_v1  ;;  %v191_v3 = vld [vmem:[%s1537_s11 + $0x28] sm:$0xff] }
  0x38   : > { %190 = vst [vmem:[%s1542_s7 + $0x10] sm:$0xff] %v189_v2  ;;  %v193_v4 = vld [vmem:[%s1537_s11 + $0x40] sm:$0xff]  ;;  %v195_v5 = vld [vmem:[%s1537_s11 + $0x48] sm:$0xff]  ;;  %192 = vst [vmem:[%s1542_s7 + $0x18] sm:$0xff] %v191_v3 }
  0x39   : > { %194 = vst [vmem:[%s1542_s7 + $0x20] sm:$0xff] %v193_v4  ;;  %196 = vst [vmem:[%s1542_s7 + $0x28] sm:$0xff] %v195_v5  ;;  %v197_v6 = vld [vmem:[%s1537_s11 + $0x60] sm:$0xff]  ;;  %v199_v7 = vld [vmem:[%s1537_s11 + $0x68] sm:$0xff] }
  0x3a   : > { %v201_v8 = vld [vmem:[%s1537_s11 + $0x80] sm:$0xff]  ;;  %198 = vst [vmem:[%s1542_s7 + $0x30] sm:$0xff] %v197_v6  ;;  %200 = vst [vmem:[%s1542_s7 + $0x38] sm:$0xff] %v199_v7  ;;  %v203_v9 = vld [vmem:[%s1537_s11 + $0x88] sm:$0xff] }
  0x3b   : > { %202 = vst [vmem:[%s1542_s7 + $0x40] sm:$0xff] %v201_v8  ;;  %v205_v10 = vld [vmem:[%s1537_s11 + $0xa0] sm:$0xff]  ;;  %v207_v11 = vld [vmem:[%s1537_s11 + $0xa8] sm:$0xff]  ;;  %204 = vst [vmem:[%s1542_s7 + $0x48] sm:$0xff] %v203_v9 }
  0x3c   : > { %206 = vst [vmem:[%s1542_s7 + $0x50] sm:$0xff] %v205_v10  ;;  %208 = vst [vmem:[%s1542_s7 + $0x58] sm:$0xff] %v207_v11  ;;  %v209_v12 = vld [vmem:[%s1537_s11 + $0xc0] sm:$0xff]  ;;  %v211_v13 = vld [vmem:[%s1537_s11 + $0xc8] sm:$0xff] }
  0x3d   : > { %v213_v14 = vld [vmem:[%s1537_s11 + $0xe0] sm:$0xff]  ;;  %210 = vst [vmem:[%s1542_s7 + $0x60] sm:$0xff] %v209_v12  ;;  %212 = vst [vmem:[%s1542_s7 + $0x68] sm:$0xff] %v211_v13  ;;  %v215_v15 = vld [vmem:[%s1537_s11 + $0xe8] sm:$0xff] }
  0x3e   : > { %214 = vst [vmem:[%s1542_s7 + $0x70] sm:$0xff] %v213_v14  ;;  %v217_v16 = vld [vmem:[%s1537_s11 + $0x100] sm:$0xff]  ;;  %v219_v17 = vld [vmem:[%s1537_s11 + $0x108] sm:$0xff]  ;;  %216 = vst [vmem:[%s1542_s7 + $0x78] sm:$0xff] %v215_v15 }
  0x3f   : > { %218 = vst [vmem:[%s1542_s7 + $0x80] sm:$0xff] %v217_v16  ;;  %220 = vst [vmem:[%s1542_s7 + $0x88] sm:$0xff] %v219_v17  ;;  %v221_v18 = vld [vmem:[%s1537_s11 + $0x120] sm:$0xff]  ;;  %v223_v19 = vld [vmem:[%s1537_s11 + $0x128] sm:$0xff] }
  0x40   : > { %v225_v20 = vld [vmem:[%s1537_s11 + $0x140] sm:$0xff]  ;;  %222 = vst [vmem:[%s1542_s7 + $0x90] sm:$0xff] %v221_v18  ;;  %224 = vst [vmem:[%s1542_s7 + $0x98] sm:$0xff] %v223_v19  ;;  %v227_v21 = vld [vmem:[%s1537_s11 + $0x148] sm:$0xff] }
  0x41   : > { %226 = vst [vmem:[%s1542_s7 + $0xa0] sm:$0xff] %v225_v20  ;;  %v229_v22 = vld [vmem:[%s1537_s11 + $0x160] sm:$0xff]  ;;  %v231_v23 = vld [vmem:[%s1537_s11 + $0x168] sm:$0xff]  ;;  %228 = vst [vmem:[%s1542_s7 + $0xa8] sm:$0xff] %v227_v21 }
  0x42   : > { %230 = vst [vmem:[%s1542_s7 + $0xb0] sm:$0xff] %v229_v22  ;;  %232 = vst [vmem:[%s1542_s7 + $0xb8] sm:$0xff] %v231_v23  ;;  %v233_v24 = vld [vmem:[%s1537_s11 + $0x180] sm:$0xff]  ;;  %v235_v25 = vld [vmem:[%s1537_s11 + $0x188] sm:$0xff] }
  0x43   : > { %v237_v26 = vld [vmem:[%s1537_s11 + $0x1a0] sm:$0xff]  ;;  %234 = vst [vmem:[%s1542_s7 + $0xc0] sm:$0xff] %v233_v24  ;;  %236 = vst [vmem:[%s1542_s7 + $0xc8] sm:$0xff] %v235_v25  ;;  %v239_v27 = vld [vmem:[%s1537_s11 + $0x1a8] sm:$0xff] }
  0x44   : > { %238 = vst [vmem:[%s1542_s7 + $0xd0] sm:$0xff] %v237_v26  ;;  %v241_v28 = vld [vmem:[%s1537_s11 + $0x1c0] sm:$0xff]  ;;  %v243_v29 = vld [vmem:[%s1537_s11 + $0x1c8] sm:$0xff]  ;;  %240 = vst [vmem:[%s1542_s7 + $0xd8] sm:$0xff] %v239_v27 }
  0x45   : > { %242 = vst [vmem:[%s1542_s7 + $0xe0] sm:$0xff] %v241_v28  ;;  %244 = vst [vmem:[%s1542_s7 + $0xe8] sm:$0xff] %v243_v29  ;;  %v245_v30 = vld [vmem:[%s1537_s11 + $0x1e0] sm:$0xff]  ;;  %v247_v31 = vld [vmem:[%s1537_s11 + $0x1e8] sm:$0xff] }
  0x46   : > { %246 = vst [vmem:[%s1542_s7 + $0xf0] sm:$0xff] %v245_v30  ;;  %248 = vst [vmem:[%s1542_s7 + $0xf8] sm:$0xff] %v247_v31 }
  0x47 PF: > { %254 = sbr.rel (!%p1494_p6) target bundleno = 97 (0x61), region = 43  ;;  %s256_s3 = sand.u32 (%p1494_p6), 1, %s1335_s16  }
  0x48   : > { %s976_s26 = sshll.u32 (%p1494_p6), %s1359_s22, 6  ;;  %s958_s28 = sshll.u32 (%p1494_p6), %s256_s3, 8 }
  0x49   : > { %s261_s29 = sadd.s32 (%p1494_p6), %s1363_s23, %s976_s26  ;;  %s1901_s1 = sld [smem:[#allocation14_spill]] (%p1494_p6) }
  0x4a   : > { %s961_s4 = sshll.u32 (%p1494_p6), %s261_s29, 3  ;;  %s1618_s9 = scalar_lea.vmem (%p1494_p6), [#allocation4], %s958_s28 }
  0x4f   : > { %s1613_s8 = scalar_lea.vmem %s1901_s1, %s961_s4 }
  0x50   : > { %v353_v32 = vld [vmem:[%s1613_s8] sm:$0xff]  ;;  %v355_v33 = vld [vmem:[%s1613_s8 + $0x10] sm:$0xff] }
  0x51   : > { %v357_v34 = vld [vmem:[%s1613_s8 + $0x20] sm:$0xff]  ;;  %354 = vst [vmem:[%s1618_s9] sm:$0xff] %v353_v32  ;;  %356 = vst [vmem:[%s1618_s9 + $0x8] sm:$0xff] %v355_v33  ;;  %v359_v35 = vld [vmem:[%s1613_s8 + $0x30] sm:$0xff] }
  0x52   : > { %358 = vst [vmem:[%s1618_s9 + $0x10] sm:$0xff] %v357_v34  ;;  %v361_v36 = vld [vmem:[%s1613_s8 + $0x40] sm:$0xff]  ;;  %v363_v37 = vld [vmem:[%s1613_s8 + $0x50] sm:$0xff]  ;;  %360 = vst [vmem:[%s1618_s9 + $0x18] sm:$0xff] %v359_v35 }
  0x53   : > { %362 = vst [vmem:[%s1618_s9 + $0x20] sm:$0xff] %v361_v36  ;;  %364 = vst [vmem:[%s1618_s9 + $0x28] sm:$0xff] %v363_v37  ;;  %v365_v38 = vld [vmem:[%s1613_s8 + $0x60] sm:$0xff]  ;;  %v367_v39 = vld [vmem:[%s1613_s8 + $0x70] sm:$0xff] }
  0x54   : > { %v369_v40 = vld [vmem:[%s1613_s8 + $0x80] sm:$0xff]  ;;  %366 = vst [vmem:[%s1618_s9 + $0x30] sm:$0xff] %v365_v38  ;;  %368 = vst [vmem:[%s1618_s9 + $0x38] sm:$0xff] %v367_v39  ;;  %v371_v41 = vld [vmem:[%s1613_s8 + $0x90] sm:$0xff] }
  0x55   : > { %370 = vst [vmem:[%s1618_s9 + $0x40] sm:$0xff] %v369_v40  ;;  %v373_v42 = vld [vmem:[%s1613_s8 + $0xa0] sm:$0xff]  ;;  %v375_v43 = vld [vmem:[%s1613_s8 + $0xb0] sm:$0xff]  ;;  %372 = vst [vmem:[%s1618_s9 + $0x48] sm:$0xff] %v371_v41 }
  0x56   : > { %374 = vst [vmem:[%s1618_s9 + $0x50] sm:$0xff] %v373_v42  ;;  %376 = vst [vmem:[%s1618_s9 + $0x58] sm:$0xff] %v375_v43  ;;  %v377_v44 = vld [vmem:[%s1613_s8 + $0xc0] sm:$0xff]  ;;  %v379_v45 = vld [vmem:[%s1613_s8 + $0xd0] sm:$0xff] }
  0x57   : > { %v381_v46 = vld [vmem:[%s1613_s8 + $0xe0] sm:$0xff]  ;;  %378 = vst [vmem:[%s1618_s9 + $0x60] sm:$0xff] %v377_v44  ;;  %380 = vst [vmem:[%s1618_s9 + $0x68] sm:$0xff] %v379_v45  ;;  %v383_v47 = vld [vmem:[%s1613_s8 + $0xf0] sm:$0xff] }
  0x58   : > { %382 = vst [vmem:[%s1618_s9 + $0x70] sm:$0xff] %v381_v46  ;;  %v385_v48 = vld [vmem:[%s1613_s8 + $0x100] sm:$0xff]  ;;  %v387_v49 = vld [vmem:[%s1613_s8 + $0x110] sm:$0xff]  ;;  %384 = vst [vmem:[%s1618_s9 + $0x78] sm:$0xff] %v383_v47 }
  0x59   : > { %386 = vst [vmem:[%s1618_s9 + $0x80] sm:$0xff] %v385_v48  ;;  %388 = vst [vmem:[%s1618_s9 + $0x88] sm:$0xff] %v387_v49  ;;  %v389_v50 = vld [vmem:[%s1613_s8 + $0x120] sm:$0xff]  ;;  %v391_v51 = vld [vmem:[%s1613_s8 + $0x130] sm:$0xff] }
  0x5a   : > { %v393_v52 = vld [vmem:[%s1613_s8 + $0x140] sm:$0xff]  ;;  %390 = vst [vmem:[%s1618_s9 + $0x90] sm:$0xff] %v389_v50  ;;  %392 = vst [vmem:[%s1618_s9 + $0x98] sm:$0xff] %v391_v51  ;;  %v395_v53 = vld [vmem:[%s1613_s8 + $0x150] sm:$0xff] }
  0x5b   : > { %394 = vst [vmem:[%s1618_s9 + $0xa0] sm:$0xff] %v393_v52  ;;  %v397_v54 = vld [vmem:[%s1613_s8 + $0x160] sm:$0xff]  ;;  %v399_v55 = vld [vmem:[%s1613_s8 + $0x170] sm:$0xff]  ;;  %396 = vst [vmem:[%s1618_s9 + $0xa8] sm:$0xff] %v395_v53 }
  0x5c   : > { %398 = vst [vmem:[%s1618_s9 + $0xb0] sm:$0xff] %v397_v54  ;;  %400 = vst [vmem:[%s1618_s9 + $0xb8] sm:$0xff] %v399_v55  ;;  %v401_v56 = vld [vmem:[%s1613_s8 + $0x180] sm:$0xff]  ;;  %v403_v57 = vld [vmem:[%s1613_s8 + $0x190] sm:$0xff] }
  0x5d   : > { %v405_v58 = vld [vmem:[%s1613_s8 + $0x1a0] sm:$0xff]  ;;  %402 = vst [vmem:[%s1618_s9 + $0xc0] sm:$0xff] %v401_v56  ;;  %404 = vst [vmem:[%s1618_s9 + $0xc8] sm:$0xff] %v403_v57  ;;  %v407_v59 = vld [vmem:[%s1613_s8 + $0x1b0] sm:$0xff] }
  0x5e   : > { %406 = vst [vmem:[%s1618_s9 + $0xd0] sm:$0xff] %v405_v58  ;;  %v409_v60 = vld [vmem:[%s1613_s8 + $0x1c0] sm:$0xff]  ;;  %v411_v61 = vld [vmem:[%s1613_s8 + $0x1d0] sm:$0xff]  ;;  %408 = vst [vmem:[%s1618_s9 + $0xd8] sm:$0xff] %v407_v59 }
  0x5f   : > { %410 = vst [vmem:[%s1618_s9 + $0xe0] sm:$0xff] %v409_v60  ;;  %412 = vst [vmem:[%s1618_s9 + $0xe8] sm:$0xff] %v411_v61  ;;  %v413_v62 = vld [vmem:[%s1613_s8 + $0x1e0] sm:$0xff]  ;;  %v415_v63 = vld [vmem:[%s1613_s8 + $0x1f0] sm:$0xff] }
  0x60   : > { %414 = vst [vmem:[%s1618_s9 + $0xf0] sm:$0xff] %v413_v62  ;;  %416 = vst [vmem:[%s1618_s9 + $0xf8] sm:$0xff] %v415_v63 }
  0x61 PF: > { %p962_p4 = scmp.ge.s32.totalorder %s1371_s25, 1  ;;  %p427_p5 = scmp.lt.s32.totalorder %s1371_s25, 9 }
  0x63   : > { %p428_p6 = pnand %p962_p4, %p427_p5 }
  0x64   : > { %s434_s11 = sand.u32 (!%p428_p6), 1, %s1339_s17   ;;  %s441_s7 = sand.u32 (!%p428_p6), 1, %s1331_s15  }
  0x65   : > { %431 = sbr.rel (%p428_p6) target bundleno = 446 (0x1be), region = 85  ;;  %s963_s3 = sshll.u32 (!%p428_p6), %s434_s11, 8 }
  0x66   : > { %s964_s26 = sshll.u32 (!%p428_p6), %s441_s7, 8  ;;  %s468_s28 = sand.u32 (!%p428_p6), 1, %s1323_s13  }
  0x67   : > { %p474_p7 = scmp.lt.s32.totalorder (!%p428_p6), %s1351_s20, 1  ;;  %s965_s29 = sshll.u32 (!%p428_p6), %s468_s28, 7 }
  0x68   : > { %s1902_s8 = sld [smem:[#allocation15_spill]] (!%p428_p6)  ;;  %s1696_s0 = scalar_lea.vmem (!%p428_p6), [#allocation3], %s963_s3 }
  0x69   : > { %s1698_s1 = scalar_lea.vmem (!%p428_p6), [#allocation4], %s964_s26  ;;  %s1700_s30 = scalar_lea.vmem (!%p428_p6), [#allocation5], %s965_s29 }
  0x6a   : > { %s1903_s15 = sld [smem:[#allocation8_spill]] (!%p428_p6) }
  0x6c   : > { %s1690_s4 = scalar_select %p474_p7, %s1351_s20, 1 }
  0x6e   : > { %s476_s9 = scalar_lea.vmem %s1902_s8, %s1690_s4 }
  0x70   : > { %p966_p8 = scmp.ne.s32.totalorder %s1903_s15, 0 }
  0x71   : > { %v1373_v0 = vmov (!%p966_p8), 0.0  }
  0x72   : > { %481 = sbr.rel (%p966_p8) target bundleno = 122 (0x7a), region = 97  ;;  %482 = vst [vmem:[#allocation2] sm:$0xff] (!%p966_p8), %v1373_v0  ;;  %483 = vst [vmem:[#allocation2 + $0x8] sm:$0xff] (!%p966_p8), %v1373_v0 }
  0x73   : > { %484 = vst [vmem:[#allocation2 + $0x10] sm:$0xff] (!%p966_p8), %v1373_v0  ;;  %485 = vst [vmem:[#allocation2 + $0x18] sm:$0xff] (!%p966_p8), %v1373_v0 }
  0x74   : > { %486 = vst [vmem:[#allocation2 + $0x20] sm:$0xff] (!%p966_p8), %v1373_v0  ;;  %487 = vst [vmem:[#allocation2 + $0x28] sm:$0xff] (!%p966_p8), %v1373_v0 }
  0x75   : > { %488 = vst [vmem:[#allocation2 + $0x30] sm:$0xff] (!%p966_p8), %v1373_v0  ;;  %489 = vst [vmem:[#allocation2 + $0x38] sm:$0xff] (!%p966_p8), %v1373_v0 }
  0x76   : > { %490 = vst [vmem:[#allocation2 + $0x40] sm:$0xff] (!%p966_p8), %v1373_v0  ;;  %491 = vst [vmem:[#allocation2 + $0x48] sm:$0xff] (!%p966_p8), %v1373_v0 }
  0x77   : > { %492 = vst [vmem:[#allocation2 + $0x50] sm:$0xff] (!%p966_p8), %v1373_v0  ;;  %493 = vst [vmem:[#allocation2 + $0x58] sm:$0xff] (!%p966_p8), %v1373_v0 }
  0x78   : > { %494 = vst [vmem:[#allocation2 + $0x60] sm:$0xff] (!%p966_p8), %v1373_v0  ;;  %495 = vst [vmem:[#allocation2 + $0x68] sm:$0xff] (!%p966_p8), %v1373_v0 }
  0x79   : > { %496 = vst [vmem:[#allocation2 + $0x70] sm:$0xff] %v1373_v0  ;;  %497 = vst [vmem:[#allocation2 + $0x78] sm:$0xff] %v1373_v0 }
  0x7a PF: > { %v562_v1 = vld [vmem:[%s1698_s1 + $0x80] sm:$0xff]  ;;  %v563_v2 = vld [vmem:[%s1698_s1 + $0x88] sm:$0xff]  ;;  %v564_v6 = vld [vmem:[%s1698_s1 + $0x90] sm:$0xff] }
  0x7b   : > { %v546_v3 = vld [vmem:[%s1698_s1] sm:$0xff]  ;;  %v1058_v4 = vpack.c.bf16 %v563_v2, %v562_v1  ;;  %v547_v5 = vld [vmem:[%s1698_s1 + $0x8] sm:$0xff]  ;;  %v565_v7 = vld [vmem:[%s1698_s1 + $0x98] sm:$0xff] }
  0x7c   : > { %v1060_v8 = vpack.c.bf16 %v547_v5, %v546_v3  ;;  %v1062_v9 = vpack.c.bf16 %v565_v7, %v564_v6  ;;  %v548_v10 = vld [vmem:[%s1698_s1 + $0x10] sm:$0xff]  ;;  %v549_v11 = vld [vmem:[%s1698_s1 + $0x18] sm:$0xff]  ;;  %v566_v12 = vld [vmem:[%s1698_s1 + $0xa0] sm:$0xff] }
  0x7d   : > { %1059 = vmatprep.subr.bf16.mxu0 %v1058_v4  ;;  %1090 = vmatprep.subr.bf16.mxu1 %v1058_v4  ;;  %v567_v13 = vld [vmem:[%s1698_s1 + $0xa8] sm:$0xff]  ;;  %v1064_v14 = vpack.c.bf16 %v549_v11, %v548_v10  ;;  %v550_v16 = vld [vmem:[%s1698_s1 + $0x20] sm:$0xff]  ;;  %v568_v18 = vld [vmem:[%s1698_s1 + $0xb0] sm:$0xff] }
  0x7e   : > { %1061 = vmatpush3.bf16.msra.mxu0 %v1060_v8  ;;  %1098 = vmatpush3.bf16.msra.mxu1 %v1060_v8  ;;  %v1066_v15 = vpack.c.bf16 %v567_v13, %v566_v12  ;;  %v551_v17 = vld [vmem:[%s1698_s1 + $0x28] sm:$0xff]  ;;  %v569_v19 = vld [vmem:[%s1698_s1 + $0xb8] sm:$0xff]  ;;  %v552_v22 = vld [vmem:[%s1698_s1 + $0x30] sm:$0xff] }
  0x7f   : > { %1063 = vmatprep.subr.bf16.mxu0 %v1062_v9  ;;  %1091 = vmatprep.subr.bf16.mxu1 %v1062_v9  ;;  %v1068_v20 = vpack.c.bf16 %v551_v17, %v550_v16  ;;  %v1070_v21 = vpack.c.bf16 %v569_v19, %v568_v18  ;;  %v553_v23 = vld [vmem:[%s1698_s1 + $0x38] sm:$0xff]  ;;  %v570_v24 = vld [vmem:[%s1698_s1 + $0xc0] sm:$0xff]  ;;  %v571_v25 = vld [vmem:[%s1698_s1 + $0xc8] sm:$0xff] }
  0x80   : > { %v515_v26 = vld [vmem:[%s1696_s0 + $0x8] sm:$0xff]  ;;  %v1072_v28 = vpack.c.bf16 %v553_v23, %v552_v22  ;;  %v1074_v29 = vpack.c.bf16 %v571_v25, %v570_v24  ;;  %v554_v30 = vld [vmem:[%s1698_s1 + $0x40] sm:$0xff]  ;;  %v572_v32 = vld [vmem:[%s1698_s1 + $0xd0] sm:$0xff] }
  0x81   : > { %642 = vmatprep.mubr.f32.mxu0 %v515_v26  ;;  %v531_v27 = vld [vmem:[%s1696_s0 + $0x88] sm:$0xff]  ;;  %v573_v33 = vld [vmem:[%s1698_s1 + $0xd8] sm:$0xff]  ;;  %v556_v36 = vld [vmem:[%s1698_s1 + $0x50] sm:$0xff] }
  0x82   : > { %1065 = vmatpush3.bf16.msra.mxu0 %v1064_v14  ;;  %1099 = vmatpush3.bf16.msra.mxu1 %v1064_v14  ;;  %v555_v31 = vld [vmem:[%s1698_s1 + $0x48] sm:$0xff]  ;;  %v1078_v35 = vpack.c.bf16 %v573_v33, %v572_v32  ;;  %v557_v37 = vld [vmem:[%s1698_s1 + $0x58] sm:$0xff]  ;;  %v574_v38 = vld [vmem:[%s1698_s1 + $0xe0] sm:$0xff] }
  0x83   : > { %1067 = vmatprep.subr.bf16.mxu0 %v1066_v15  ;;  %1092 = vmatprep.subr.bf16.mxu1 %v1066_v15  ;;  %v1076_v34 = vpack.c.bf16 %v555_v31, %v554_v30  ;;  %v575_v39 = vld [vmem:[%s1698_s1 + $0xe8] sm:$0xff]  ;;  %v1080_v40 = vpack.c.bf16 %v557_v37, %v556_v36  ;;  %v558_v42 = vld [vmem:[%s1698_s1 + $0x60] sm:$0xff]  ;;  %v576_v44 = vld [vmem:[%s1698_s1 + $0xf0] sm:$0xff] }
  0x84   : > { %682 = vmatprep.mubr.f32.mxu1 %v531_v27  ;;  %v1082_v41 = vpack.c.bf16 %v575_v39, %v574_v38  ;;  %v559_v43 = vld [vmem:[%s1698_s1 + $0x68] sm:$0xff]  ;;  %v577_v45 = vld [vmem:[%s1698_s1 + $0xf8] sm:$0xff]  ;;  %v560_v48 = vld [vmem:[%s1698_s1 + $0x70] sm:$0xff] }
  0x85   : > { %v1084_v46 = vpack.c.bf16 %v559_v43, %v558_v42  ;;  %v1086_v47 = vpack.c.bf16 %v577_v45, %v576_v44  ;;  %v561_v49 = vld [vmem:[%s1698_s1 + $0x78] sm:$0xff]  ;;  %v514_v51 = vld [vmem:[%s1696_s0] sm:$0xff]  ;;  %v516_v55 = vld [vmem:[%s1696_s0 + $0x10] sm:$0xff] }
  0x86   : > { %1069 = vmatpush3.bf16.msra.mxu0 %v1068_v20  ;;  %1100 = vmatpush3.bf16.msra.mxu1 %v1068_v20  ;;  %v1088_v50 = vpack.c.bf16 %v561_v49, %v560_v48  ;;  %v530_v52 = vld [vmem:[%s1696_s0 + $0x80] sm:$0xff]  ;;  %v517_v53 = vld [vmem:[%s1696_s0 + $0x18] sm:$0xff]  ;;  %v532_v56 = vld [vmem:[%s1696_s0 + $0x90] sm:$0xff] }
  0x87   : > { %1071 = vmatprep.subr.bf16.mxu0 %v1070_v21  ;;  %1093 = vmatprep.subr.bf16.mxu1 %v1070_v21  ;;  %v533_v54 = vld [vmem:[%s1696_s0 + $0x98] sm:$0xff]  ;;  %v519_v57 = vld [vmem:[%s1696_s0 + $0x28] sm:$0xff]  ;;  %v518_v59 = vld [vmem:[%s1696_s0 + $0x20] sm:$0xff] }
  0x88   : > { %v535_v58 = vld [vmem:[%s1696_s0 + $0xa8] sm:$0xff]  ;;  %v534_v60 = vld [vmem:[%s1696_s0 + $0xa0] sm:$0xff]  ;;  %v521_v61 = vld [vmem:[%s1696_s0 + $0x38] sm:$0xff] }
  0x89   : > { %v537_v62 = vld [vmem:[%s1696_s0 + $0xb8] sm:$0xff]  ;;  %v520_v63 = vld [vmem:[%s1696_s0 + $0x30] sm:$0xff]  ;;  %v523_v1 = vld [vmem:[%s1696_s0 + $0x48] sm:$0xff] }
  0x8a   : > { %1073 = vmatpush3.bf16.msra.mxu0 %v1072_v28  ;;  %1101 = vmatpush3.bf16.msra.mxu1 %v1072_v28  ;;  %v536_v0 = vld [vmem:[%s1696_s0 + $0xb0] sm:$0xff]  ;;  %v539_v2 = vld [vmem:[%s1696_s0 + $0xc8] sm:$0xff]  ;;  %v522_v3 = vld [vmem:[%s1696_s0 + $0x40] sm:$0xff] }
  0x8b   : > { %1075 = vmatprep.subr.bf16.mxu0 %v1074_v29  ;;  %1094 = vmatprep.subr.bf16.mxu1 %v1074_v29  ;;  %v538_v4 = vld [vmem:[%s1696_s0 + $0xc0] sm:$0xff]  ;;  %v525_v5 = vld [vmem:[%s1696_s0 + $0x58] sm:$0xff]  ;;  %v524_v7 = vld [vmem:[%s1696_s0 + $0x50] sm:$0xff] }
  0x8c   : > { %v541_v6 = vld [vmem:[%s1696_s0 + $0xd8] sm:$0xff]  ;;  %v540_v8 = vld [vmem:[%s1696_s0 + $0xd0] sm:$0xff]  ;;  %v527_v9 = vld [vmem:[%s1696_s0 + $0x68] sm:$0xff] }
  0x8d   : > { %v543_v10 = vld [vmem:[%s1696_s0 + $0xe8] sm:$0xff]  ;;  %v526_v11 = vld [vmem:[%s1696_s0 + $0x60] sm:$0xff]  ;;  %v529_v13 = vld [vmem:[%s1696_s0 + $0x78] sm:$0xff] }
  0x8e   : > { %1077 = vmatpush3.bf16.msra.mxu0 %v1076_v34  ;;  %1102 = vmatpush3.bf16.msra.mxu1 %v1076_v34  ;;  %v542_v12 = vld [vmem:[%s1696_s0 + $0xe0] sm:$0xff]  ;;  %v545_v14 = vld [vmem:[%s1696_s0 + $0xf8] sm:$0xff]  ;;  %v528_v15 = vld [vmem:[%s1696_s0 + $0x70] sm:$0xff] }
  0x8f   : > { %1079 = vmatprep.subr.bf16.mxu0 %v1078_v35  ;;  %1095 = vmatprep.subr.bf16.mxu1 %v1078_v35  ;;  %v544_v16 = vld [vmem:[%s1696_s0 + $0xf0] sm:$0xff]  ;;  %v498_v19 = vld [vmem:[#allocation2] sm:$0xff]  ;;  %v499_v29 = vld [vmem:[#allocation2 + $0x8] sm:$0xff]  ;;  %s1904_s0 = sld [smem:[#allocation8_spill]] }
  0x90   : > { %v506_v21 = vld [vmem:[#allocation2 + $0x40] sm:$0xff]  ;;  %v507_v31 = vld [vmem:[#allocation2 + $0x48] sm:$0xff]  ;;  %v500_v39 = vld [vmem:[#allocation2 + $0x10] sm:$0xff] }
  0x91   : > { %v501_v49 = vld [vmem:[#allocation2 + $0x18] sm:$0xff] }
  0x92   : > { %1081 = vmatpush3.bf16.msra.mxu0 %v1080_v40  ;;  %1103 = vmatpush3.bf16.msra.mxu1 %v1080_v40 }
  0x93   : > { %1083 = vmatprep.subr.bf16.mxu0 %v1082_v41  ;;  %1096 = vmatprep.subr.bf16.mxu1 %v1082_v41  ;;  %v508_v41 = vld [vmem:[#allocation2 + $0x50] sm:$0xff] }
  0x95   : > { %p967_p9 = scmp.ne.s32.totalorder %s1904_s0, 1 }
  0x96   : > { %1085 = vmatpush3.bf16.msra.mxu0 %v1084_v46  ;;  %1104 = vmatpush3.bf16.msra.mxu1 %v1084_v46 }
  0x97   : > { %1087 = vmatprep.subr.bf16.mxu0 %v1086_v47  ;;  %1097 = vmatprep.subr.bf16.mxu1 %v1086_v47 }
  0x9a   : > { %1089 = vmatpush3.bf16.msra.mxu0 %v1088_v50  ;;  %1105 = vmatpush3.bf16.msra.mxu1 %v1088_v50 }
  0x9d   : > { %643 = vmatmul.mubr.f32.vlgmr.msra.gmra.mrb[0].mxu0 %v514_v51  ;;  %683 = vmatmul.mubr.f32.vlgmr.msra.gmra.mrb[0].mxu1 %v530_v52  ;;  %v509_v51 = vld [vmem:[#allocation2 + $0x58] sm:$0xff] }
  0x9e   : > { %647 = vmatprep.mubr.f32.mxu0 %v517_v53  ;;  %687 = vmatprep.mubr.f32.mxu1 %v533_v54 }
  0xa1   : > { %648 = vmatmul.mubr.f32.gmra.mrb[2].mxu0 %v516_v55  ;;  %688 = vmatmul.mubr.f32.gmra.mrb[2].mxu1 %v532_v56 }
  0xa2   : > { %652 = vmatprep.mubr.f32.mxu0 %v519_v57  ;;  %692 = vmatprep.mubr.f32.mxu1 %v535_v58 }
  0xa5   : > { %653 = vmatmul.mubr.f32.gmra.mrb[4].mxu0 %v518_v59  ;;  %693 = vmatmul.mubr.f32.gmra.mrb[4].mxu1 %v534_v60  ;;  %v502_v59 = vld [vmem:[#allocation2 + $0x20] sm:$0xff] }
  0xa6   : > { %657 = vmatprep.mubr.f32.mxu0 %v521_v61  ;;  %697 = vmatprep.mubr.f32.mxu1 %v537_v62  ;;  %v510_v61 = vld [vmem:[#allocation2 + $0x60] sm:$0xff] }
  0xa9   : > { %658 = vmatmul.mubr.f32.gmra.mrb[6].mxu0 %v520_v63  ;;  %698 = vmatmul.mubr.f32.gmra.mrb[6].mxu1 %v536_v0 }
  0xaa   : > { %662 = vmatprep.mubr.f32.mxu0 %v523_v1  ;;  %702 = vmatprep.mubr.f32.mxu1 %v539_v2 }
  0xad   : > { %663 = vmatmul.mubr.f32.gmra.mrb[8].mxu0 %v522_v3  ;;  %703 = vmatmul.mubr.f32.gmra.mrb[8].mxu1 %v538_v4 }
  0xae   : > { %667 = vmatprep.mubr.f32.mxu0 %v525_v5  ;;  %707 = vmatprep.mubr.f32.mxu1 %v541_v6  ;;  %v503_v5 = vld [vmem:[#allocation2 + $0x28] sm:$0xff] }
  0xb1   : > { %668 = vmatmul.mubr.f32.gmra.mrb[10].mxu0 %v524_v7  ;;  %708 = vmatmul.mubr.f32.gmra.mrb[10].mxu1 %v540_v8  ;;  %v511_v7 = vld [vmem:[#allocation2 + $0x68] sm:$0xff] }
  0xb2   : > { %672 = vmatprep.mubr.f32.mxu0 %v527_v9  ;;  %712 = vmatprep.mubr.f32.mxu1 %v543_v10 }
  0xb5   : > { %673 = vmatmul.mubr.f32.gmra.mrb[12].mxu0 %v526_v11  ;;  %713 = vmatmul.mubr.f32.gmra.mrb[12].mxu1 %v542_v12 }
  0xb6   : > { %677 = vmatprep.mubr.f32.mxu0 %v529_v13  ;;  %717 = vmatprep.mubr.f32.mxu1 %v545_v14 }
  0xb9   : > { %678 = vmatmul.mubr.f32.gmra.mrb[14].mxu0 %v528_v15  ;;  %718 = vmatmul.mubr.f32.gmra.mrb[14].mxu1 %v544_v16  ;;  %v504_v15 = vld [vmem:[#allocation2 + $0x30] sm:$0xff] }
 0x170   : > { %v1010_v17 = vpop.f32.mrb[0].mxu0  ;;  %v1034_v18 = vpop.f32.mrb[0].mxu1 }
 0x171   : > { %v1011_v20 = vpop.f32.mrb[1].mxu0  ;;  %v1035_v22 = vpop.f32.mrb[1].mxu1 }
 0x172   : > { %v1012_v23 = vadd.f32 %v1011_v20, %v1010_v17  ;;  %v1036_v24 = vadd.f32 %v1035_v22, %v1034_v18  ;;  %v512_v17 = vld [vmem:[#allocation2 + $0x70] sm:$0xff] }
 0x174   : > { %v723_v25 = vadd.f32 %v1012_v23, %v498_v19  ;;  %v731_v26 = vadd.f32 %v1036_v24, %v506_v21  ;;  %v1013_v27 = vpop.f32.mrb[2].mxu0  ;;  %v1037_v28 = vpop.f32.mrb[2].mxu1 }
 0x175   : > { %v1014_v30 = vpop.f32.mrb[3].mxu0  ;;  %v1038_v32 = vpop.f32.mrb[3].mxu1 }
 0x176   : > { %739 = vst [vmem:[#allocation2] sm:$0xff] %v723_v25  ;;  %747 = vst [vmem:[#allocation2 + $0x40] sm:$0xff] %v731_v26  ;;  %v1015_v33 = vadd.f32 %v1014_v30, %v1013_v27  ;;  %v1039_v34 = vadd.f32 %v1038_v32, %v1037_v28  ;;  %v505_v25 = vld [vmem:[#allocation2 + $0x38] sm:$0xff] }
 0x177   : > { %v513_v27 = vld [vmem:[#allocation2 + $0x78] sm:$0xff] }
 0x178   : > { %v724_v35 = vadd.f32 %v1015_v33, %v499_v29  ;;  %v732_v36 = vadd.f32 %v1039_v34, %v507_v31  ;;  %v1016_v37 = vpop.f32.mrb[4].mxu0  ;;  %v1040_v38 = vpop.f32.mrb[4].mxu1  ;;  %v968_v34 = vld [vmem:[%s476_s9] ss:$0 sm:$0xff] (!%p967_p9) }
 0x179   : > { %v1017_v40 = vpop.f32.mrb[5].mxu0  ;;  %v1041_v42 = vpop.f32.mrb[5].mxu1 }
 0x17a   : > { %740 = vst [vmem:[#allocation2 + $0x8] sm:$0xff] %v724_v35  ;;  %748 = vst [vmem:[#allocation2 + $0x48] sm:$0xff] %v732_v36  ;;  %v1018_v43 = vadd.f32 %v1017_v40, %v1016_v37  ;;  %v1042_v44 = vadd.f32 %v1041_v42, %v1040_v38 }
 0x17c   : > { %v725_v45 = vadd.f32 %v1018_v43, %v500_v39  ;;  %v733_v46 = vadd.f32 %v1042_v44, %v508_v41  ;;  %v1019_v47 = vpop.f32.mrb[6].mxu0  ;;  %v1043_v48 = vpop.f32.mrb[6].mxu1 }
 0x17d   : > { %v1020_v50 = vpop.f32.mrb[7].mxu0  ;;  %v1044_v52 = vpop.f32.mrb[7].mxu1  ;;  %v759_v33 = vld [vmem:[#allocation2] sm:$0xff] (!%p967_p9) }
 0x17e   : > { %741 = vst [vmem:[#allocation2 + $0x10] sm:$0xff] %v725_v45  ;;  %749 = vst [vmem:[#allocation2 + $0x50] sm:$0xff] %v733_v46  ;;  %v1021_v53 = vadd.f32 %v1020_v50, %v1019_v47  ;;  %v1045_v54 = vadd.f32 %v1044_v52, %v1043_v48  ;;  %v782_v36 = vadd.f32 (!%p967_p9), %v968_v34, %v759_v33  ;;  %v767_v50 = vld [vmem:[#allocation2 + $0x40] sm:$0xff] (!%p967_p9) }
 0x180   : > { %v726_v55 = vadd.f32 %v1021_v53, %v501_v49  ;;  %v734_v56 = vadd.f32 %v1045_v54, %v509_v51  ;;  %v1022_v57 = vpop.f32.mrb[8].mxu0  ;;  %v1046_v58 = vpop.f32.mrb[8].mxu1  ;;  %798 = vst [vmem:[%s1700_s30] sm:$0xff] (!%p967_p9), %v782_v36  ;;  %v790_v53 = vadd.f32 (!%p967_p9), %v968_v34, %v767_v50 }
 0x181   : > { %v1023_v60 = vpop.f32.mrb[9].mxu0  ;;  %v1047_v62 = vpop.f32.mrb[9].mxu1  ;;  %v760_v35 = vld [vmem:[#allocation2 + $0x8] sm:$0xff] (!%p967_p9) }
 0x182   : > { %742 = vst [vmem:[#allocation2 + $0x18] sm:$0xff] %v726_v55  ;;  %750 = vst [vmem:[#allocation2 + $0x58] sm:$0xff] %v734_v56  ;;  %v1024_v63 = vadd.f32 %v1023_v60, %v1022_v57  ;;  %v1048_v0 = vadd.f32 %v1047_v62, %v1046_v58  ;;  %v783_v37 = vadd.f32 (!%p967_p9), %v968_v34, %v760_v35  ;;  %v768_v51 = vld [vmem:[#allocation2 + $0x48] sm:$0xff] (!%p967_p9) }
 0x183   : > { %v791_v54 = vadd.f32 (!%p967_p9), %v968_v34, %v768_v51  ;;  %806 = vst [vmem:[%s1700_s30 + $0x40] sm:$0xff] (!%p967_p9), %v790_v53 }
 0x184   : > { %v727_v1 = vadd.f32 %v1024_v63, %v502_v59  ;;  %v735_v2 = vadd.f32 %v1048_v0, %v510_v61  ;;  %v1025_v3 = vpop.f32.mrb[10].mxu0  ;;  %v1049_v4 = vpop.f32.mrb[10].mxu1  ;;  %799 = vst [vmem:[%s1700_s30 + $0x8] sm:$0xff] (!%p967_p9), %v783_v37 }
 0x185   : > { %v1026_v6 = vpop.f32.mrb[11].mxu0  ;;  %v1050_v8 = vpop.f32.mrb[11].mxu1  ;;  %v761_v38 = vld [vmem:[#allocation2 + $0x10] sm:$0xff] (!%p967_p9)  ;;  %807 = vst [vmem:[%s1700_s30 + $0x48] sm:$0xff] (!%p967_p9), %v791_v54 }
 0x186   : > { %743 = vst [vmem:[#allocation2 + $0x20] sm:$0xff] %v727_v1  ;;  %751 = vst [vmem:[#allocation2 + $0x60] sm:$0xff] %v735_v2  ;;  %v1027_v9 = vadd.f32 %v1026_v6, %v1025_v3  ;;  %v1051_v10 = vadd.f32 %v1050_v8, %v1049_v4  ;;  %v784_v41 = vadd.f32 (!%p967_p9), %v968_v34, %v761_v38  ;;  %v769_v52 = vld [vmem:[#allocation2 + $0x50] sm:$0xff] (!%p967_p9) }
 0x187   : > { %v792_v55 = vadd.f32 (!%p967_p9), %v968_v34, %v769_v52 }
 0x188   : > { %v728_v11 = vadd.f32 %v1027_v9, %v503_v5  ;;  %v736_v12 = vadd.f32 %v1051_v10, %v511_v7  ;;  %v1028_v13 = vpop.f32.mrb[12].mxu0  ;;  %v1052_v14 = vpop.f32.mrb[12].mxu1  ;;  %800 = vst [vmem:[%s1700_s30 + $0x10] sm:$0xff] (!%p967_p9), %v784_v41 }
 0x189   : > { %v1029_v16 = vpop.f32.mrb[13].mxu0  ;;  %v1053_v18 = vpop.f32.mrb[13].mxu1  ;;  %v762_v39 = vld [vmem:[#allocation2 + $0x18] sm:$0xff] (!%p967_p9)  ;;  %808 = vst [vmem:[%s1700_s30 + $0x50] sm:$0xff] (!%p967_p9), %v792_v55 }
 0x18a   : > { %744 = vst [vmem:[#allocation2 + $0x28] sm:$0xff] %v728_v11  ;;  %752 = vst [vmem:[#allocation2 + $0x68] sm:$0xff] %v736_v12  ;;  %v1030_v19 = vadd.f32 %v1029_v16, %v1028_v13  ;;  %v1054_v20 = vadd.f32 %v1053_v18, %v1052_v14  ;;  %v785_v42 = vadd.f32 (!%p967_p9), %v968_v34, %v762_v39  ;;  %v770_v56 = vld [vmem:[#allocation2 + $0x58] sm:$0xff] (!%p967_p9) }
 0x18b   : > { %v793_v59 = vadd.f32 (!%p967_p9), %v968_v34, %v770_v56 }
 0x18c   : > { %v729_v21 = vadd.f32 %v1030_v19, %v504_v15  ;;  %v737_v22 = vadd.f32 %v1054_v20, %v512_v17  ;;  %v1031_v23 = vpop.f32.mrb[14].mxu0  ;;  %v1055_v24 = vpop.f32.mrb[14].mxu1  ;;  %758 = sbr.rel (%p967_p9) target bundleno = 414 (0x19e), region = 101  ;;  %801 = vst [vmem:[%s1700_s30 + $0x18] sm:$0xff] (!%p967_p9), %v785_v42 }
 0x18d   : > { %v1032_v26 = vpop.f32.mrb[15].mxu0  ;;  %v1056_v28 = vpop.f32.mrb[15].mxu1  ;;  %v763_v40 = vld [vmem:[#allocation2 + $0x20] sm:$0xff] (!%p967_p9)  ;;  %809 = vst [vmem:[%s1700_s30 + $0x58] sm:$0xff] (!%p967_p9), %v793_v59 }
 0x18e   : > { %745 = vst [vmem:[#allocation2 + $0x30] sm:$0xff] %v729_v21  ;;  %753 = vst [vmem:[#allocation2 + $0x70] sm:$0xff] %v737_v22  ;;  %v1033_v29 = vadd.f32 %v1032_v26, %v1031_v23  ;;  %v1057_v30 = vadd.f32 %v1056_v28, %v1055_v24  ;;  %v786_v43 = vadd.f32 (!%p967_p9), %v968_v34, %v763_v40  ;;  %v771_v57 = vld [vmem:[#allocation2 + $0x60] sm:$0xff] (!%p967_p9) }
 0x18f   : > { %v794_v60 = vadd.f32 (!%p967_p9), %v968_v34, %v771_v57 }
 0x190   : > { %v730_v31 = vadd.f32 %v1033_v29, %v505_v25  ;;  %v738_v32 = vadd.f32 %v1057_v30, %v513_v27  ;;  %802 = vst [vmem:[%s1700_s30 + $0x20] sm:$0xff] (!%p967_p9), %v786_v43 }
 0x191   : > { %v764_v44 = vld [vmem:[#allocation2 + $0x28] sm:$0xff] (!%p967_p9)  ;;  %810 = vst [vmem:[%s1700_s30 + $0x60] sm:$0xff] (!%p967_p9), %v794_v60 }
 0x192   : > { %746 = vst [vmem:[#allocation2 + $0x38] sm:$0xff] %v730_v31  ;;  %754 = vst [vmem:[#allocation2 + $0x78] sm:$0xff] %v738_v32  ;;  %v787_v47 = vadd.f32 (!%p967_p9), %v968_v34, %v764_v44  ;;  %v772_v58 = vld [vmem:[#allocation2 + $0x68] sm:$0xff] (!%p967_p9) }
 0x193   : > { %v795_v61 = vadd.f32 %v968_v34, %v772_v58 }
 0x194   : > { %803 = vst [vmem:[%s1700_s30 + $0x28] sm:$0xff] %v787_v47 }
 0x195   : > { %v765_v45 = vld [vmem:[#allocation2 + $0x30] sm:$0xff]  ;;  %811 = vst [vmem:[%s1700_s30 + $0x68] sm:$0xff] %v795_v61 }
 0x196   : > { %v788_v48 = vadd.f32 %v968_v34, %v765_v45  ;;  %v773_v62 = vld [vmem:[#allocation2 + $0x70] sm:$0xff] }
 0x197   : > { %v796_v0 = vadd.f32 %v968_v34, %v773_v62 }
 0x198   : > { %804 = vst [vmem:[%s1700_s30 + $0x30] sm:$0xff] %v788_v48 }
 0x199   : > { %v766_v46 = vld [vmem:[#allocation2 + $0x38] sm:$0xff]  ;;  %812 = vst [vmem:[%s1700_s30 + $0x70] sm:$0xff] %v796_v0 }
 0x19a   : > { %v789_v49 = vadd.f32 %v968_v34, %v766_v46  ;;  %v774_v63 = vld [vmem:[#allocation2 + $0x78] sm:$0xff] }
 0x19b   : > { %v797_v1 = vadd.f32 %v968_v34, %v774_v63 }
 0x19c   : > { %805 = vst [vmem:[%s1700_s30 + $0x38] sm:$0xff] %v789_v49 }
 0x19d   : > { %813 = vst [vmem:[%s1700_s30 + $0x78] sm:$0xff] %v797_v1 }
 0x19e PF: > { %s1906_s7 = sld [smem:[#allocation9_spill]]  ;;  %s830_s29 = sshll.u32 %s1700_s30, 4  ;;  %s1792_s29 = int_to_ptr.vmem [resolvable:$true] %s830_s29 }
 0x19f   : > { %s1907_s8 = sld [smem:[#allocation16_spill]]  ;;  %s1801_s15 = scalar_lea.sflag [#allocation6], %s468_s28 }
 0x1a0   : > { %s1229_s0 = scalar_lea.vmem %s1792_s29, 2048 }
 0x1a1   : > { %p1230_p10 = scmp.ne.s32.totalorder %s1792_s29, %s1229_s0 }
 0x1a3   : > { %p1231_p11 = pnand %p1230_p10, %p1518_p0 }
 0x1a4   : > { %s977_s3 = sshll.u32 %s1906_s7, 5 }
 0x1a5   : > { %s827_s26 = sadd.s32 %s1351_s20, %s977_s3  ;;  %p1232_p12 = pneg %p1231_p11 }
 0x1a6   : > { %s972_s4 = sshll.u32 %s827_s26, 7  ;;  %s1374_s20 = smov [#allocation5]  }
 0x1a7   : > { %s1797_s9 = scalar_lea.hbm %s1907_s8, %s972_s4  ;;  %s1233_s30 = sshll.u32 %s1374_s20, 4  ;;  %s1234_s30 = int_to_ptr.vmem [resolvable:$false] %s1233_s30 }
 0x1a8   : > { %s1235_s1 = scalar_lea.vmem %s1234_s30, 4096  ;;  %p1236_p13 = scmp.lt.s32.totalorder %s1792_s29, %s1234_s30 }
 0x1a9   : > { %p1237_p1 = scmp.lt.s32.totalorder %s1235_s1, %s1229_s0 }
 0x1ab   : > { %p1238_p3 = por %p1237_p1, %p1236_p13 }
 0x1ad   : > { %p1239_p4 = pnand %p1238_p3, %p1232_p12 }
 0x1af   : > { %1242 = shalt.err (!%p1239_p4)
}
 0x1b0   : > { %s1243_s28 = scalar_lea.hbm %s1797_s9, 2048  ;;  %s1247_s7 = scalar_lea.hbm %s1907_s8, 8192 }
 0x1b1   : > { %p1244_p5 = scmp.ne.s32.totalorder %s1797_s9, %s1243_s28  ;;  %p1248_p8 = scmp.lt.u32.totalorder %s1797_s9, %s1907_s8 }
 0x1b2   : > { %p1249_p9 = scmp.lt.u32.totalorder %s1247_s7, %s1243_s28  ;;  %p1251_p11 = scmp.lt.u32.totalorder %s1243_s28, %s1797_s9 }
 0x1b3   : > { %p1245_p6 = pnand %p1244_p5, %p1518_p0 }
 0x1b4   : > { %p1250_p10 = por %p1249_p9, %p1248_p8 }
 0x1b5   : > { %p1246_p7 = pneg %p1245_p6 }
 0x1b6   : > { %p1252_p12 = por %p1251_p11, %p1250_p10 }
 0x1b8   : > { %p1253_p13 = pnand %p1252_p12, %p1246_p7 }
 0x1ba   : > { %1256 = shalt.err (!%p1253_p13)
}
 0x1bb   : > { %s1375_s4 = smov 128   ;;  %s1376_s5 = smov 256  }
 0x1bc   : > { %s1377_s2 = smov 8  }
 0x1bd   : > { %1106 = dma.vmem_to_hbm [thread:$0]  (%p1518_p0), %s1792_s29, 2048, %s1797_s9, %s1801_s15, %s1375_s4, %s1376_s5, %s1377_s2  }
 0x1be PF: > { %p1112_p1 = scmp.ge.s32.totalorder %s1371_s25, 2  ;;  %s845_s0 = sand.u32 1, %s1319_s12  }
 0x1bf   : > { %s846_s20 = scalar_lea.sflag [#allocation6], %s845_s0 }
 0x1c0   : > { %p1109_p3 = pnand %p1112_p1, %p1524_p2 }
 0x1c2   : > { %1314 = dma.done.wait (!%p1109_p3), %s846_s20, 2048  }
 0x1c3   : > { %1316 = vsyncadd (!%p1109_p3), %s846_s20, 4294965248  ;;  %s16_s25 = sadd.s32 1, %s1371_s25   ;;  %s1909_s10 = sld [smem:[#allocation10_spill]] }
 0x1c4   : > { %p1830_p4 = scmp.ge.s32.totalorder %s16_s25, 10   ;;  %s1910_s6 = sld [smem:[#allocation11_spill]] }
 0x1c5   : > { %s1911_s29 = sld [smem:[#allocation12_spill]]  ;;  %s1912_s12 = smov %s1323_s13 }
 0x1c6   : > { %s1913_s13 = smov %s1327_s14  ;;  %s1914_s14 = smov %s1516_s19 }
 0x1c7   : > { %s1915_s15 = smov %s1335_s16  ;;  %s1916_s16 = smov %s1502_s27 }
 0x1c8   : > { %s1917_s17 = smov %s1343_s18  ;;  %s1918_s18 = smov %s1513_s21 }
 0x1c9   : > { %s1919_s19 = smov %s1359_s22  ;;  %s1920_s20 = smov %s1363_s23 }
 0x1ca   : > { %s1921_s21 = smov %s1367_s24  ;;  %s1922_s22 = smov %s1909_s10 }
 0x1cb   : > { %s1923_s23 = smov %s1910_s6  ;;  %s1924_s24 = smov %s1911_s29 }
 0x1cc   :  { %15 = sbr.rel (!%p1830_p4) target bundleno = 13 (0xd), region = 152 }
 0x1d3   :  { %851 = vsyncpa [#allocation6], 1 }
 0x1d4   :  { %853 = vsyncpa [#allocation6 + $0x1], 1 }

</bundles_post_ra>
